<compile_context>
chip_gen: v7x
topology: tpu7x:2x2x1
jax: 0.10.0
libtpu: 0.0.40
codegen_flags: <defaults>
</compile_context>

<pallas_src>
import jax
import jax.numpy as jnp
import numpy as np
from jax.experimental import pallas as pl
from jax.experimental.pallas import tpu as pltpu

C = 128          # feature dim
NUM_HEADS = 4
NUM_CLASSES = 4
MAX_BATCH_TILE = 1024   # multiple of 8 sublanes; footprint stays << VMEM


def _round_up(x, m):
    return ((x + m - 1) // m) * m


# ----------------------------------------------------------------------------
# Pallas kernel: per batch-tile forward pass up to relu(fc(.)) (lane-dense out)
# ----------------------------------------------------------------------------
def _classifier_kernel(
    img_ref, rep_ref, clin_ref,
    w_img1_ref, w_rep1_ref, pub1b_w_ref, eff1_b_ref, pub1_b_ref,   # stage 1
    pub2_w_ref, pub2_b_ref,                                        # pub[2]
    w_rad2_ref, w_clin2_ref, fcb_w_ref, eff2_b_ref, fc_b_ref,      # stage 2
    hid_ref,
):
    f32 = jnp.float32
    bf16 = jnp.bfloat16

    img = img_ref[...]
    rep = rep_ref[...]
    clin = clin_ref[...]

    # ---- stage 1: attn_image_report (folded) + pub[0] contributions -------
    # Fused RHS: lanes [0:128] = W_eff1 (attention value projection),
    #            lanes [128:256] = this operand's 128-row slice of pub[0].
    img_h = jnp.dot(img.astype(bf16), w_img1_ref[...], preferred_element_type=f32)
    rep_h = jnp.dot(rep.astype(bf16), w_rep1_ref[...], preferred_element_type=f32)

    gate_from_img = img_h[:, :C] + eff1_b_ref[...]   # proj(v(img)) -> gates rep
    gate_from_rep = rep_h[:, :C] + eff1_b_ref[...]   # proj(v(rep)) -> gates img
    pub_ir = img + img * gate_from_rep + rep + rep * gate_from_img

    # pub: Linear(384,128) -> ReLU -> Linear(128,128), concat-free
    rad = (img_h[:, C:] + rep_h[:, C:]
           + jnp.dot(pub_ir.astype(bf16), pub1b_w_ref[...],
                     preferred_element_type=f32)
           + pub1_b_ref[...])
    rad = jnp.maximum(rad, 0.0)
    rad = (jnp.dot(rad.astype(bf16), pub2_w_ref[...],
                   preferred_element_type=f32)
           + pub2_b_ref[...])

    # ---- stage 2: attn_rad_clin (folded) + fc contributions ----------------
    rad_h = jnp.dot(rad.astype(bf16), w_rad2_ref[...], preferred_element_type=f32)
    clin_h = jnp.dot(clin.astype(bf16), w_clin2_ref[...], preferred_element_type=f32)

    gate_from_rad = rad_h[:, :C] + eff2_b_ref[...]    # proj(v(rad))  -> gates clin
    gate_from_clin = clin_h[:, :C] + eff2_b_ref[...]  # proj(v(clin)) -> gates rad
    pub_rc = rad + rad * gate_from_clin + clin + clin * gate_from_rad

    hidden = (rad_h[:, C:] + clin_h[:, C:]
              + jnp.dot(pub_rc.astype(bf16), fcb_w_ref[...],
                        preferred_element_type=f32)
              + fc_b_ref[...])
    hid_ref[...] = jnp.maximum(hidden, 0.0).astype(hid_ref.dtype)


# ----------------------------------------------------------------------------
# Host-side parameter folding (done ONCE, outside the per-call path)
# ----------------------------------------------------------------------------
def prepare_params(params):
    (qkv1_w, qkv1_b, proj1_w, proj1_b,
     pub1_w, pub1_b, pub2_w, pub2_b,
     qkv2_w, qkv2_b, proj2_w, proj2_b,
     fc_w, fc_b, cls_w, cls_b) = params

    f32 = jnp.float32
    bf16 = jnp.bfloat16

    wv1, bv1 = qkv1_w[:, 2 * C:3 * C], qkv1_b[:, 2 * C:3 * C]
    eff1_w = wv1 @ proj1_w
    eff1_b = bv1 @ proj1_w + proj1_b

    wv2, bv2 = qkv2_w[:, 2 * C:3 * C], qkv2_b[:, 2 * C:3 * C]
    eff2_w = wv2 @ proj2_w
    eff2_b = bv2 @ proj2_w + proj2_b

    pub1a, pub1b, pub1c = pub1_w[0:C], pub1_w[C:2 * C], pub1_w[2 * C:3 * C]
    fca, fcb, fcc = fc_w[0:C], fc_w[C:2 * C], fc_w[2 * C:3 * C]

    # 256-lane fused RHS (one MXU push per operand on v6e/v7x; neutral on v5e)
    w_img1 = jnp.concatenate([eff1_w, pub1a], axis=1).astype(bf16)   # (128,256)
    w_rep1 = jnp.concatenate([eff1_w, pub1c], axis=1).astype(bf16)   # (128,256)
    w_rad2 = jnp.concatenate([eff2_w, fca], axis=1).astype(bf16)     # (128,256)
    w_clin2 = jnp.concatenate([eff2_w, fcc], axis=1).astype(bf16)    # (128,256)

    kernel_params = (
        w_img1, w_rep1, pub1b.astype(bf16),
        eff1_b.astype(f32), pub1_b.astype(f32),
        pub2_w.astype(bf16), pub2_b.astype(f32),
        w_rad2, w_clin2, fcb.astype(bf16),
        eff2_b.astype(f32), fc_b.astype(f32),
    )
    head_params = (cls_w, cls_b)
    return kernel_params, head_params


# ----------------------------------------------------------------------------
# Wrapper
# ----------------------------------------------------------------------------
@jax.jit
def classifier_forward(image_features, report_features, clin_features,
                       kernel_params, head_params):
    B = image_features.shape[0]
    cls_w, cls_b = head_params

    # Batch tile: whole batch for tiny B; for B > 64 use >= 2 grid steps so the
    # "parallel" axis can shard across both TensorCores on v7x, with tiles up
    # to 1024 rows for efficient DMA.
    if B <= 64:
        TB = B
    else:
        TB = min(MAX_BATCH_TILE, _round_up(pl.cdiv(B, 2), 8))
    grid = (pl.cdiv(B, TB),)

    feat_spec = pl.BlockSpec((TB, C), lambda i: (i, 0))
    wide_w_spec = pl.BlockSpec((C, 2 * C), lambda i: (0, 0))   # VMEM-resident
    sq_w_spec = pl.BlockSpec((C, C), lambda i: (0, 0))
    bias_spec = pl.BlockSpec((1, C), lambda i: (0, 0))
    param_specs = [wide_w_spec, wide_w_spec, sq_w_spec, bias_spec, bias_spec,
                   sq_w_spec, bias_spec,
                   wide_w_spec, wide_w_spec, sq_w_spec, bias_spec, bias_spec]

    hidden = pl.pallas_call(
        _classifier_kernel,
        out_shape=jax.ShapeDtypeStruct((B, C), jnp.bfloat16),
        grid=grid,
        in_specs=[feat_spec, feat_spec, feat_spec] + param_specs,
        out_specs=pl.BlockSpec((TB, C), lambda i: (i, 0)),
        compiler_params=pltpu.CompilerParams(
            dimension_semantics=("parallel",),
            vmem_limit_bytes=32 * 1024 * 1024),
    )(image_features, report_features, clin_features, *kernel_params)

    # Tiny (128 -> 4) classifier head in plain JAX keeps the kernel's output
    # store lane-dense (no masked 4-lane stores / near-empty MXU pass).
    outputs = hidden.astype(jnp.float32) @ cls_w + cls_b
    return outputs, 0


# ----------------------------------------------------------------------------
# Deterministic parameter init (matching nn.Linear shapes; stored as (in, out))
# ----------------------------------------------------------------------------
def init_params(key):
    def linear_params(key, fan_in, fan_out):
        kw, kb = jax.random.split(key)
        bound = 1.0 / np.sqrt(fan_in)
        w = jax.random.uniform(kw, (fan_in, fan_out), jnp.float32, -bound, bound)
        b = jax.random.uniform(kb, (1, fan_out), jnp.float32, -bound, bound)
        return w, b

    keys = jax.random.split(key, 8)
    qkv1_w, qkv1_b = linear_params(keys[0], C, 3 * C)       # attn1.qkv
    proj1_w, proj1_b = linear_params(keys[1], C, C)         # attn1.proj
    pub1_w, pub1_b = linear_params(keys[2], 3 * C, C)       # pub[0]
    pub2_w, pub2_b = linear_params(keys[3], C, C)           # pub[2]
    qkv2_w, qkv2_b = linear_params(keys[4], C, 3 * C)       # attn2.qkv
    proj2_w, proj2_b = linear_params(keys[5], C, C)         # attn2.proj
    fc_w, fc_b = linear_params(keys[6], 3 * C, C)           # fc
    cls_w, cls_b = linear_params(keys[7], C, NUM_CLASSES)   # classifier
    return (qkv1_w, qkv1_b, proj1_w, proj1_b,
            pub1_w, pub1_b, pub2_w, pub2_b,
            qkv2_w, qkv2_b, proj2_w, proj2_b,
            fc_w, fc_b, cls_w, cls_b)


# ----------------------------------------------------------------------------
# Pure-JAX reference (faithful transcription of the PyTorch forward, including
# per-head attention + softmax, all in f32) — used to validate the kernel.
# ----------------------------------------------------------------------------
def _ref_mi_attention(image, report, qkv_w, qkv_b, proj_w, proj_b):
    B, N_i, Cdim = image.shape
    _, N_r, _ = report.shape
    hd = Cdim // NUM_HEADS
    scale = hd ** -0.5

    def split_qkv(x, N):
        qkv = x @ qkv_w + qkv_b                              # (B, N, 3C)
        qkv = qkv.reshape(B, N, 3, NUM_HEADS, hd).transpose(2, 0, 3, 1, 4)
        return qkv[0], qkv[1], qkv[2]                        # each (B, H, N, hd)

    q_i, k_i, v_i = split_qkv(image, N_i)
    q_r, k_r, v_r = split_qkv(report, N_r)
    attn_i = jax.nn.softmax(q_i @ k_r.transpose(0, 1, 3, 2) * scale, axis=-1)
    attn_r = jax.nn.softmax(q_r @ k_i.transpose(0, 1, 3, 2) * scale, axis=-1)
    attn_i_x = (attn_i @ v_r).transpose(0, 2, 1, 3).reshape(B, N_i, Cdim)
    attn_r_x = (attn_r @ v_i).transpose(0, 2, 1, 3).reshape(B, N_r, Cdim)
    attn_i_x = attn_i_x @ proj_w + proj_b
    attn_r_x = attn_r_x @ proj_w + proj_b
    image_out = image + image * attn_i_x
    report_out = report + report * attn_r_x
    return image_out + report_out


def _ref_forward(image, report, clin, params):
    (qkv1_w, qkv1_b, proj1_w, proj1_b,
     pub1_w, pub1_b, pub2_w, pub2_b,
     qkv2_w, qkv2_b, proj2_w, proj2_b,
     fc_w, fc_b, cls_w, cls_b) = params
    pub_ir = _ref_mi_attention(image[:, None, :], report[:, None, :],
                               qkv1_w, qkv1_b, proj1_w, proj1_b)[:, 0, :]
    cat1 = jnp.concatenate([image, pub_ir, report], axis=1)
    rad = jnp.maximum(cat1 @ pub1_w + pub1_b, 0.0) @ pub2_w + pub2_b
    pub_rc = _ref_mi_attention(rad[:, None, :], clin[:, None, :],
                               qkv2_w, qkv2_b, proj2_w, proj2_b)[:, 0, :]
    cat2 = jnp.concatenate([rad, pub_rc, clin], axis=1)
    hidden = jnp.maximum(cat2 @ fc_w + fc_b, 0.0)
    return hidden @ cls_w + cls_b


# ----------------------------------------------------------------------------
if __name__ == "__main__":
    key = jax.random.PRNGKey(0)
    k_img, k_rep, k_clin, k_params = jax.random.split(key, 4)

    B = 8
    image_features = jax.random.normal(k_img, (B, C), jnp.float32)
    report_features = jax.random.normal(k_rep, (B, C), jnp.float32)
    clin_features = jax.random.normal(k_clin, (B, C), jnp.float32)
    params = init_params(k_params)

    # Fold / cast / fuse weights once (hoisted out of the per-call path).
    kernel_params, head_params = prepare_params(params)
    kernel_params = jax.block_until_ready(kernel_params)

    outputs, aux = classifier_forward(
        image_features, report_features, clin_features,
        kernel_params, head_params)
    outputs = jax.block_until_ready(outputs)
    assert outputs.shape == (B, NUM_CLASSES)
    assert aux == 0

    ref = _ref_forward(image_features, report_features, clin_features, params)
    # bf16 MXU operands + bf16 hidden writeback (f32 accumulate throughout):
    # tolerance widened accordingly; the algebraic folds themselves are exact.
    np.testing.assert_allclose(np.asarray(outputs), np.asarray(ref),
                               rtol=5e-2, atol=5e-2)

    print("KERNEL_OK")
</pallas_src>

<mosaic_0001>
module attributes {stable_mosaic.version = 11 : i64} {
  func.func @_classifier_kernel(%arg0: i32, %arg1: memref<8x128xf32, #tpu.memory_space<vmem>>, %arg2: memref<8x128xf32, #tpu.memory_space<vmem>>, %arg3: memref<8x128xf32, #tpu.memory_space<vmem>>, %arg4: memref<128x256xbf16, #tpu.memory_space<vmem>>, %arg5: memref<128x256xbf16, #tpu.memory_space<vmem>>, %arg6: memref<128x128xbf16, #tpu.memory_space<vmem>>, %arg7: memref<1x128xf32, #tpu.memory_space<vmem>>, %arg8: memref<1x128xf32, #tpu.memory_space<vmem>>, %arg9: memref<128x128xbf16, #tpu.memory_space<vmem>>, %arg10: memref<1x128xf32, #tpu.memory_space<vmem>>, %arg11: memref<128x256xbf16, #tpu.memory_space<vmem>>, %arg12: memref<128x256xbf16, #tpu.memory_space<vmem>>, %arg13: memref<128x128xbf16, #tpu.memory_space<vmem>>, %arg14: memref<1x128xf32, #tpu.memory_space<vmem>>, %arg15: memref<1x128xf32, #tpu.memory_space<vmem>>, %arg16: memref<8x128xbf16, #tpu.memory_space<vmem>>) attributes {dimension_semantics = [#tpu.dimension_semantics<parallel>], iteration_bounds = array<i64: 1>, scalar_prefetch = 0 : i64, scratch_operands = 0 : i64, tpu.core_type = #tpu.core_type<tc>, window_params = [{transform_indices = @transform_0, window_bounds = array<i64: 8, 128>}, {transform_indices = @transform_1, window_bounds = array<i64: 8, 128>}, {transform_indices = @transform_2, window_bounds = array<i64: 8, 128>}, {pipeline_mode = #tpu.pipeline_mode<synchronous>, transform_indices = @transform_3, window_bounds = array<i64: 128, 256>}, {pipeline_mode = #tpu.pipeline_mode<synchronous>, transform_indices = @transform_4, window_bounds = array<i64: 128, 256>}, {pipeline_mode = #tpu.pipeline_mode<synchronous>, transform_indices = @transform_5, window_bounds = array<i64: 128, 128>}, {pipeline_mode = #tpu.pipeline_mode<synchronous>, transform_indices = @transform_6, window_bounds = array<i64: 1, 128>}, {pipeline_mode = #tpu.pipeline_mode<synchronous>, transform_indices = @transform_7, window_bounds = array<i64: 1, 128>}, {pipeline_mode = #tpu.pipeline_mode<synchronous>, transform_indices = @transform_8, window_bounds = array<i64: 128, 128>}, {pipeline_mode = #tpu.pipeline_mode<synchronous>, transform_indices = @transform_9, window_bounds = array<i64: 1, 128>}, {pipeline_mode = #tpu.pipeline_mode<synchronous>, transform_indices = @transform_10, window_bounds = array<i64: 128, 256>}, {pipeline_mode = #tpu.pipeline_mode<synchronous>, transform_indices = @transform_11, window_bounds = array<i64: 128, 256>}, {pipeline_mode = #tpu.pipeline_mode<synchronous>, transform_indices = @transform_12, window_bounds = array<i64: 128, 128>}, {pipeline_mode = #tpu.pipeline_mode<synchronous>, transform_indices = @transform_13, window_bounds = array<i64: 1, 128>}, {pipeline_mode = #tpu.pipeline_mode<synchronous>, transform_indices = @transform_14, window_bounds = array<i64: 1, 128>}, {transform_indices = @transform_15, window_bounds = array<i64: 8, 128>}]} {
    %c0 = arith.constant 0 : index
    %c0_0 = arith.constant 0 : index
    %0 = vector.load %arg1[%c0, %c0_0] : memref<8x128xf32, #tpu.memory_space<vmem>>, vector<8x128xf32>
    %c0_1 = arith.constant 0 : index
    %c0_2 = arith.constant 0 : index
    %1 = vector.load %arg2[%c0_1, %c0_2] : memref<8x128xf32, #tpu.memory_space<vmem>>, vector<8x128xf32>
    %c0_3 = arith.constant 0 : index
    %c0_4 = arith.constant 0 : index
    %2 = vector.load %arg3[%c0_3, %c0_4] : memref<8x128xf32, #tpu.memory_space<vmem>>, vector<8x128xf32>
    %3 = arith.truncf %0 : vector<8x128xf32> to vector<8x128xbf16>
    %c0_5 = arith.constant 0 : index
    %c0_6 = arith.constant 0 : index
    %4 = vector.load %arg4[%c0_5, %c0_6] : memref<128x256xbf16, #tpu.memory_space<vmem>>, vector<128x256xbf16>
    %cst = arith.constant dense<0.000000e+00> : vector<8x256xf32>
    %5 = tpu.matmul %3, %4, %cst {dimension_numbers = #tpu.dot_dimension_numbers<[1], [0], [0], [1], [0, 0, 1, 1], [], []>} : vector<8x128xbf16>, vector<128x256xbf16>, vector<8x256xf32> -> vector<8x256xf32>
    %6 = arith.truncf %1 : vector<8x128xf32> to vector<8x128xbf16>
    %c0_7 = arith.constant 0 : index
    %c0_8 = arith.constant 0 : index
    %7 = vector.load %arg5[%c0_7, %c0_8] : memref<128x256xbf16, #tpu.memory_space<vmem>>, vector<128x256xbf16>
    %cst_9 = arith.constant dense<0.000000e+00> : vector<8x256xf32>
    %8 = tpu.matmul %6, %7, %cst_9 {dimension_numbers = #tpu.dot_dimension_numbers<[1], [0], [0], [1], [0, 0, 1, 1], [], []>} : vector<8x128xbf16>, vector<128x256xbf16>, vector<8x256xf32> -> vector<8x256xf32>
    %9 = vector.extract_strided_slice %5 {offsets = [0, 0], sizes = [8, 128], strides = [1, 1]} : vector<8x256xf32> to vector<8x128xf32>
    %c0_10 = arith.constant 0 : index
    %c0_11 = arith.constant 0 : index
    %10 = vector.load %arg7[%c0_10, %c0_11] : memref<1x128xf32, #tpu.memory_space<vmem>>, vector<1x128xf32>
    %11 = vector.broadcast %10 : vector<1x128xf32> to vector<8x128xf32>
    %12 = arith.addf %9, %11 : vector<8x128xf32>
    %13 = vector.extract_strided_slice %8 {offsets = [0, 0], sizes = [8, 128], strides = [1, 1]} : vector<8x256xf32> to vector<8x128xf32>
    %c0_12 = arith.constant 0 : index
    %c0_13 = arith.constant 0 : index
    %14 = vector.load %arg7[%c0_12, %c0_13] : memref<1x128xf32, #tpu.memory_space<vmem>>, vector<1x128xf32>
    %15 = vector.broadcast %14 : vector<1x128xf32> to vector<8x128xf32>
    %16 = arith.addf %13, %15 : vector<8x128xf32>
    %17 = arith.mulf %0, %16 : vector<8x128xf32>
    %18 = arith.addf %0, %17 : vector<8x128xf32>
    %19 = arith.addf %18, %1 : vector<8x128xf32>
    %20 = arith.mulf %1, %12 : vector<8x128xf32>
    %21 = arith.addf %19, %20 : vector<8x128xf32>
    %22 = vector.extract_strided_slice %5 {offsets = [0, 128], sizes = [8, 128], strides = [1, 1]} : vector<8x256xf32> to vector<8x128xf32>
    %23 = vector.extract_strided_slice %8 {offsets = [0, 128], sizes = [8, 128], strides = [1, 1]} : vector<8x256xf32> to vector<8x128xf32>
    %24 = arith.addf %22, %23 : vector<8x128xf32>
    %25 = arith.truncf %21 : vector<8x128xf32> to vector<8x128xbf16>
    %c0_14 = arith.constant 0 : index
    %c0_15 = arith.constant 0 : index
    %26 = vector.load %arg6[%c0_14, %c0_15] : memref<128x128xbf16, #tpu.memory_space<vmem>>, vector<128x128xbf16>
    %cst_16 = arith.constant dense<0.000000e+00> : vector<8x128xf32>
    %27 = tpu.matmul %25, %26, %cst_16 {dimension_numbers = #tpu.dot_dimension_numbers<[1], [0], [0], [1], [0, 0, 1, 1], [], []>} : vector<8x128xbf16>, vector<128x128xbf16>, vector<8x128xf32> -> vector<8x128xf32>
    %28 = arith.addf %24, %27 : vector<8x128xf32>
    %c0_17 = arith.constant 0 : index
    %c0_18 = arith.constant 0 : index
    %29 = vector.load %arg8[%c0_17, %c0_18] : memref<1x128xf32, #tpu.memory_space<vmem>>, vector<1x128xf32>
    %30 = vector.broadcast %29 : vector<1x128xf32> to vector<8x128xf32>
    %31 = arith.addf %28, %30 : vector<8x128xf32>
    %cst_19 = arith.constant 0.000000e+00 : f32
    %32 = vector.broadcast %cst_19 : f32 to vector<8x128xf32>
    %33 = arith.maximumf %31, %32 : vector<8x128xf32>
    %34 = arith.truncf %33 : vector<8x128xf32> to vector<8x128xbf16>
    %c0_20 = arith.constant 0 : index
    %c0_21 = arith.constant 0 : index
    %35 = vector.load %arg9[%c0_20, %c0_21] : memref<128x128xbf16, #tpu.memory_space<vmem>>, vector<128x128xbf16>
    %cst_22 = arith.constant dense<0.000000e+00> : vector<8x128xf32>
    %36 = tpu.matmul %34, %35, %cst_22 {dimension_numbers = #tpu.dot_dimension_numbers<[1], [0], [0], [1], [0, 0, 1, 1], [], []>} : vector<8x128xbf16>, vector<128x128xbf16>, vector<8x128xf32> -> vector<8x128xf32>
    %c0_23 = arith.constant 0 : index
    %c0_24 = arith.constant 0 : index
    %37 = vector.load %arg10[%c0_23, %c0_24] : memref<1x128xf32, #tpu.memory_space<vmem>>, vector<1x128xf32>
    %38 = vector.broadcast %37 : vector<1x128xf32> to vector<8x128xf32>
    %39 = arith.addf %36, %38 : vector<8x128xf32>
    %40 = arith.truncf %39 : vector<8x128xf32> to vector<8x128xbf16>
    %c0_25 = arith.constant 0 : index
    %c0_26 = arith.constant 0 : index
    %41 = vector.load %arg11[%c0_25, %c0_26] : memref<128x256xbf16, #tpu.memory_space<vmem>>, vector<128x256xbf16>
    %cst_27 = arith.constant dense<0.000000e+00> : vector<8x256xf32>
    %42 = tpu.matmul %40, %41, %cst_27 {dimension_numbers = #tpu.dot_dimension_numbers<[1], [0], [0], [1], [0, 0, 1, 1], [], []>} : vector<8x128xbf16>, vector<128x256xbf16>, vector<8x256xf32> -> vector<8x256xf32>
    %43 = arith.truncf %2 : vector<8x128xf32> to vector<8x128xbf16>
    %c0_28 = arith.constant 0 : index
    %c0_29 = arith.constant 0 : index
    %44 = vector.load %arg12[%c0_28, %c0_29] : memref<128x256xbf16, #tpu.memory_space<vmem>>, vector<128x256xbf16>
    %cst_30 = arith.constant dense<0.000000e+00> : vector<8x256xf32>
    %45 = tpu.matmul %43, %44, %cst_30 {dimension_numbers = #tpu.dot_dimension_numbers<[1], [0], [0], [1], [0, 0, 1, 1], [], []>} : vector<8x128xbf16>, vector<128x256xbf16>, vector<8x256xf32> -> vector<8x256xf32>
    %46 = vector.extract_strided_slice %42 {offsets = [0, 0], sizes = [8, 128], strides = [1, 1]} : vector<8x256xf32> to vector<8x128xf32>
    %c0_31 = arith.constant 0 : index
    %c0_32 = arith.constant 0 : index
    %47 = vector.load %arg14[%c0_31, %c0_32] : memref<1x128xf32, #tpu.memory_space<vmem>>, vector<1x128xf32>
    %48 = vector.broadcast %47 : vector<1x128xf32> to vector<8x128xf32>
    %49 = arith.addf %46, %48 : vector<8x128xf32>
    %50 = vector.extract_strided_slice %45 {offsets = [0, 0], sizes = [8, 128], strides = [1, 1]} : vector<8x256xf32> to vector<8x128xf32>
    %c0_33 = arith.constant 0 : index
    %c0_34 = arith.constant 0 : index
    %51 = vector.load %arg14[%c0_33, %c0_34] : memref<1x128xf32, #tpu.memory_space<vmem>>, vector<1x128xf32>
    %52 = vector.broadcast %51 : vector<1x128xf32> to vector<8x128xf32>
    %53 = arith.addf %50, %52 : vector<8x128xf32>
    %54 = arith.mulf %39, %53 : vector<8x128xf32>
    %55 = arith.addf %39, %54 : vector<8x128xf32>
    %56 = arith.addf %55, %2 : vector<8x128xf32>
    %57 = arith.mulf %2, %49 : vector<8x128xf32>
    %58 = arith.addf %56, %57 : vector<8x128xf32>
    %59 = vector.extract_strided_slice %42 {offsets = [0, 128], sizes = [8, 128], strides = [1, 1]} : vector<8x256xf32> to vector<8x128xf32>
    %60 = vector.extract_strided_slice %45 {offsets = [0, 128], sizes = [8, 128], strides = [1, 1]} : vector<8x256xf32> to vector<8x128xf32>
    %61 = arith.addf %59, %60 : vector<8x128xf32>
    %62 = arith.truncf %58 : vector<8x128xf32> to vector<8x128xbf16>
    %c0_35 = arith.constant 0 : index
    %c0_36 = arith.constant 0 : index
    %63 = vector.load %arg13[%c0_35, %c0_36] : memref<128x128xbf16, #tpu.memory_space<vmem>>, vector<128x128xbf16>
    %cst_37 = arith.constant dense<0.000000e+00> : vector<8x128xf32>
    %64 = tpu.matmul %62, %63, %cst_37 {dimension_numbers = #tpu.dot_dimension_numbers<[1], [0], [0], [1], [0, 0, 1, 1], [], []>} : vector<8x128xbf16>, vector<128x128xbf16>, vector<8x128xf32> -> vector<8x128xf32>
    %65 = arith.addf %61, %64 : vector<8x128xf32>
    %c0_38 = arith.constant 0 : index
    %c0_39 = arith.constant 0 : index
    %66 = vector.load %arg15[%c0_38, %c0_39] : memref<1x128xf32, #tpu.memory_space<vmem>>, vector<1x128xf32>
    %67 = vector.broadcast %66 : vector<1x128xf32> to vector<8x128xf32>
    %68 = arith.addf %65, %67 : vector<8x128xf32>
    %cst_40 = arith.constant 0.000000e+00 : f32
    %69 = vector.broadcast %cst_40 : f32 to vector<8x128xf32>
    %70 = arith.maximumf %68, %69 : vector<8x128xf32>
    %71 = arith.truncf %70 : vector<8x128xf32> to vector<8x128xbf16>
    %c0_41 = arith.constant 0 : index
    %c0_42 = arith.constant 0 : index
    %72 = vector.load %arg16[%c0_41, %c0_42] : memref<8x128xbf16, #tpu.memory_space<vmem>>, vector<8x128xbf16>
    tpu.vector_store %arg16[%c0_41, %c0_42], %71 {strides = array<i32>} : memref<8x128xbf16, #tpu.memory_space<vmem>>, vector<8x128xbf16>,
    return
  }
  func.func @transform_0(%arg0: i32) -> (i32, i32) {
    %c0_i32 = arith.constant 0 : i32
    %c0_i32_0 = arith.constant 0 : i32
    return %arg0, %c0_i32 : i32, i32
  }
  func.func @transform_1(%arg0: i32) -> (i32, i32) {
    %c0_i32 = arith.constant 0 : i32
    %c0_i32_0 = arith.constant 0 : i32
    return %arg0, %c0_i32 : i32, i32
  }
  func.func @transform_2(%arg0: i32) -> (i32, i32) {
    %c0_i32 = arith.constant 0 : i32
    %c0_i32_0 = arith.constant 0 : i32
    return %arg0, %c0_i32 : i32, i32
  }
  func.func @transform_3(%arg0: i32) -> (i32, i32) {
    %c0_i32 = arith.constant 0 : i32
    %c0_i32_0 = arith.constant 0 : i32
    %c0_i32_1 = arith.constant 0 : i32
    return %c0_i32, %c0_i32_0 : i32, i32
  }
  func.func @transform_4(%arg0: i32) -> (i32, i32) {
    %c0_i32 = arith.constant 0 : i32
    %c0_i32_0 = arith.constant 0 : i32
    %c0_i32_1 = arith.constant 0 : i32
    return %c0_i32, %c0_i32_0 : i32, i32
  }
  func.func @transform_5(%arg0: i32) -> (i32, i32) {
    %c0_i32 = arith.constant 0 : i32
    %c0_i32_0 = arith.constant 0 : i32
    %c0_i32_1 = arith.constant 0 : i32
    return %c0_i32, %c0_i32_0 : i32, i32
  }
  func.func @transform_6(%arg0: i32) -> (i32, i32) {
    %c0_i32 = arith.constant 0 : i32
    %c0_i32_0 = arith.constant 0 : i32
    %c0_i32_1 = arith.constant 0 : i32
    return %c0_i32, %c0_i32_0 : i32, i32
  }
  func.func @transform_7(%arg0: i32) -> (i32, i32) {
    %c0_i32 = arith.constant 0 : i32
    %c0_i32_0 = arith.constant 0 : i32
    %c0_i32_1 = arith.constant 0 : i32
    return %c0_i32, %c0_i32_0 : i32, i32
  }
  func.func @transform_8(%arg0: i32) -> (i32, i32) {
    %c0_i32 = arith.constant 0 : i32
    %c0_i32_0 = arith.constant 0 : i32
    %c0_i32_1 = arith.constant 0 : i32
    return %c0_i32, %c0_i32_0 : i32, i32
  }
  func.func @transform_9(%arg0: i32) -> (i32, i32) {
    %c0_i32 = arith.constant 0 : i32
    %c0_i32_0 = arith.constant 0 : i32
    %c0_i32_1 = arith.constant 0 : i32
    return %c0_i32, %c0_i32_0 : i32, i32
  }
  func.func @transform_10(%arg0: i32) -> (i32, i32) {
    %c0_i32 = arith.constant 0 : i32
    %c0_i32_0 = arith.constant 0 : i32
    %c0_i32_1 = arith.constant 0 : i32
    return %c0_i32, %c0_i32_0 : i32, i32
  }
  func.func @transform_11(%arg0: i32) -> (i32, i32) {
    %c0_i32 = arith.constant 0 : i32
    %c0_i32_0 = arith.constant 0 : i32
    %c0_i32_1 = arith.constant 0 : i32
    return %c0_i32, %c0_i32_0 : i32, i32
  }
  func.func @transform_12(%arg0: i32) -> (i32, i32) {
    %c0_i32 = arith.constant 0 : i32
    %c0_i32_0 = arith.constant 0 : i32
    %c0_i32_1 = arith.constant 0 : i32
    return %c0_i32, %c0_i32_0 : i32, i32
  }
  func.func @transform_13(%arg0: i32) -> (i32, i32) {
    %c0_i32 = arith.constant 0 : i32
    %c0_i32_0 = arith.constant 0 : i32
    %c0_i32_1 = arith.constant 0 : i32
    return %c0_i32, %c0_i32_0 : i32, i32
  }
  func.func @transform_14(%arg0: i32) -> (i32, i32) {
    %c0_i32 = arith.constant 0 : i32
    %c0_i32_0 = arith.constant 0 : i32
    %c0_i32_1 = arith.constant 0 : i32
    return %c0_i32, %c0_i32_0 : i32, i32
  }
  func.func @transform_15(%arg0: i32) -> (i32, i32) {
    %c0_i32 = arith.constant 0 : i32
    %c0_i32_0 = arith.constant 0 : i32
    return %arg0, %c0_i32 : i32, i32
  }
}

</mosaic_0001>

<bundles_post_ra>
// kernel: classifier_forward.1
= control target key start
LH: loop header
LB: loop body
LE: loop exit
PB: predicated region body
PF: predicated region fallthrough
CT: control target
= control target key end

     0   :  { %20 = vsyncpa [#allocation3], 0  ;;  %s1893_s0 = inlined_call_operand.vmem [shape: f32[8,128], index: 0, kind: input, shape index: {}]   ;;  %s1894_s1 = inlined_call_operand.hbm [shape: f32[8,128], index: 1, kind: input, shape index: {}]   ;;  %s1895_s2 = inlined_call_operand.vmem [shape: f32[8,128], index: 2, kind: input, shape index: {}]   ;;  %s1896_s3 = inlined_call_operand.hbm [shape: bf16[128,256], index: 3, kind: input, shape index: {}]   ;;  %s1897_s4 = inlined_call_operand.hbm [shape: bf16[128,256], index: 4, kind: input, shape index: {}]   ;;  %s1898_s5 = inlined_call_operand.hbm [shape: bf16[128,128], index: 5, kind: input, shape index: {}]   ;;  %s1899_s6 = inlined_call_operand.vmem [shape: f32[1,128], index: 6, kind: input, shape index: {}]   ;;  %s1900_s7 = inlined_call_operand.vmem [shape: f32[1,128], index: 7, kind: input, shape index: {}]   ;;  %s1901_s8 = inlined_call_operand.hbm [shape: bf16[128,128], index: 8, kind: input, shape index: {}]   ;;  %s1902_s9 = inlined_call_operand.vmem [shape: f32[1,128], index: 9, kind: input, shape index: {}]   ;;  %s1903_s10 = inlined_call_operand.hbm [shape: bf16[128,256], index: 10, kind: input, shape index: {}]   ;;  %s1904_s11 = inlined_call_operand.hbm [shape: bf16[128,256], index: 11, kind: input, shape index: {}]   ;;  %s1905_s12 = inlined_call_operand.hbm [shape: bf16[128,128], index: 12, kind: input, shape index: {}]   ;;  %s1906_s13 = inlined_call_operand.vmem [shape: f32[1,128], index: 13, kind: input, shape index: {}]   ;;  %s1907_s14 = inlined_call_operand.vmem [shape: f32[1,128], index: 14, kind: input, shape index: {}]   ;;  %s1908_s15 = inlined_call_operand.vmem [shape: bf16[8,128], index: 15, kind: output, shape index: {}]  }
   0x1   :  { %21 = vsyncpa [#allocation5], 0 }
   0x2   :  { %22 = vsyncpa [#allocation8], 0 }
   0x3   :  { %23 = vsyncpa [#allocation11], 0 }
   0x4   :  { %24 = vsyncpa [#allocation14], 0  ;;  %s1597_s18 = smov [#allocation4]   ;;  %s1411_s22 = scalar_lea.hbm %s1896_s3, 2048 }
   0x5   :  { %s44_s19 = sshll.u32 %s1597_s18, 4  ;;  %p1412_p0 = scmp.ne.s32.totalorder %s1896_s3, %s1411_s22  ;;  %s45_s19 = int_to_ptr.vmem [resolvable:$true] %s44_s19 }
   0x6   :  { %p1415_p1 = scmp.lt.u32.totalorder %s1411_s22, %s1896_s3 }
   0x8   :  { %p1417_p2 = pnand %p1415_p1, %p1412_p0 }
   0xa   :  { %1420 = shalt.err (!%p1417_p2)
}
   0xb   :  { %s1421_s27 = scalar_lea.vmem %s45_s19, 2048  ;;  %p1426_p4 = scmp.lt.s32.totalorder %s45_s19, %s45_s19 }
   0xc   :  { %p1422_p3 = scmp.ne.s32.totalorder %s45_s19, %s1421_s27  ;;  %p1427_p5 = scmp.lt.s32.totalorder %s1421_s27, %s1421_s27 }
   0xe   :  { %p1428_p6 = por %p1427_p5, %p1426_p4 }
  0x10   :  { %p1429_p7 = pnand %p1428_p6, %p1422_p3 }
  0x12   :  { %1432 = shalt.err (!%p1429_p7)
}
  0x13   :  { %s1909_s28 = smov 128   ;;  %s1911_s29 = smov 8  }
  0x14   :  { %50 = dma.hbm_to_vmem [thread:$0]  %s1896_s3, 2048, %s45_s19, [#allocation5], %s1909_s28, %s1909_s28, %s1911_s29  }
  0x15   :  { %s1600_s17 = smov [#allocation7]   ;;  %s1433_s22 = scalar_lea.hbm %s1898_s5, 1024 }
  0x16   :  { %s68_s18 = sshll.u32 %s1600_s17, 4  ;;  %p1434_p8 = scmp.ne.s32.totalorder %s1898_s5, %s1433_s22  ;;  %s69_s18 = int_to_ptr.vmem [resolvable:$true] %s68_s18 }
  0x17   :  { %p1437_p9 = scmp.lt.u32.totalorder %s1433_s22, %s1898_s5 }
  0x19   :  { %p1439_p10 = pnand %p1437_p9, %p1434_p8 }
  0x1b   :  { %1442 = shalt.err (!%p1439_p10)
}
  0x1c   :  { %s1443_s27 = scalar_lea.vmem %s69_s18, 1024  ;;  %p1448_p12 = scmp.lt.s32.totalorder %s69_s18, %s69_s18 }
  0x1d   :  { %p1444_p11 = scmp.ne.s32.totalorder %s69_s18, %s1443_s27  ;;  %p1449_p13 = scmp.lt.s32.totalorder %s1443_s27, %s1443_s27 }
  0x1f   :  { %p1450_p0 = por %p1449_p13, %p1448_p12 }
  0x21   :  { %p1451_p1 = pnand %p1450_p0, %p1444_p11 }
  0x23   :  { %1454 = shalt.err (!%p1451_p1)
}
  0x24   :  { %s1601_s3 = smov 64   ;;  %s1602_s19 = smov 4  }
  0x25   :  { %74 = dma.hbm_to_vmem [thread:$0]  %s1898_s5, 1024, %s69_s18, [#allocation8], %s1601_s3, %s1601_s3, %s1602_s19  }
  0x26   :  { %s1603_s17 = smov [#allocation10]   ;;  %s1604_s21 = smov [#allocation2]  }
  0x27   :  { %s98_s20 = sshll.u32 %s1603_s17, 4  ;;  %s33_s22 = sshll.u32 %s1604_s21, 4  ;;  %s99_s20 = int_to_ptr.vmem [resolvable:$true] %s98_s20  ;;  %s34_s22 = int_to_ptr.vmem [resolvable:$true] %s33_s22 }
  0x28   :  { %s1455_s25 = scalar_lea.hbm %s1903_s10, 2048 }
  0x29   :  { %p1456_p2 = scmp.ne.s32.totalorder %s1903_s10, %s1455_s25  ;;  %p1459_p3 = scmp.lt.u32.totalorder %s1455_s25, %s1903_s10 }
  0x2b   :  { %p1461_p4 = pnand %p1459_p3, %p1456_p2 }
  0x2d   :  { %1464 = shalt.err (!%p1461_p4)
}
  0x2e   :  { %s1465_s5 = scalar_lea.vmem %s99_s20, 2048  ;;  %p1470_p6 = scmp.lt.s32.totalorder %s99_s20, %s99_s20 }
  0x2f   :  { %p1466_p5 = scmp.ne.s32.totalorder %s99_s20, %s1465_s5  ;;  %p1471_p7 = scmp.lt.s32.totalorder %s1465_s5, %s1465_s5 }
  0x31   :  { %p1472_p8 = por %p1471_p7, %p1470_p6 }
  0x33   :  { %p1473_p9 = pnand %p1472_p8, %p1466_p5 }
  0x35   :  { %1476 = shalt.err (!%p1473_p9)
}
  0x36   :  { %s1913_s18 = smov 8   ;;  %s1914_s30 = smov 128  }
  0x37   :  { %104 = dma.hbm_to_vmem [thread:$0]  %s1903_s10, 2048, %s99_s20, [#allocation11], %s1914_s30, %s1914_s30, %s1913_s18  }
  0x38   :  { %s1477_s28 = scalar_lea.hbm %s1894_s1, 128 }
  0x39   :  { %p1478_p10 = scmp.ne.s32.totalorder %s1894_s1, %s1477_s28  ;;  %p1481_p11 = scmp.lt.u32.totalorder %s1477_s28, %s1894_s1 }
  0x3b   :  { %p1483_p12 = pnand %p1481_p11, %p1478_p10 }
  0x3d   :  { %1486 = shalt.err (!%p1483_p12)
}
  0x3e   :  { %s1487_s27 = scalar_lea.vmem %s34_s22, 128  ;;  %p1492_p0 = scmp.lt.s32.totalorder %s34_s22, %s34_s22 }
  0x3f   :  { %p1488_p13 = scmp.ne.s32.totalorder %s34_s22, %s1487_s27  ;;  %p1493_p1 = scmp.lt.s32.totalorder %s1487_s27, %s1487_s27 }
  0x41   :  { %p1494_p2 = por %p1493_p1, %p1492_p0 }
  0x43   :  { %p1495_p3 = pnand %p1494_p2, %p1488_p13 }
  0x45   :  { %1498 = shalt.err (!%p1495_p3)
}
  0x46   :  { %36 = dma.hbm_to_vmem [thread:$0]  %s1894_s1, 128, %s34_s22, [#allocation3]  }
  0x47   :  { %s1605_s5 = smov [#allocation6]   ;;  %s1606_s17 = smov [#allocation9]  }
  0x48   :  { %s56_s16 = sshll.u32 %s1605_s5, 4  ;;  %s84_s21 = sshll.u32 %s1606_s17, 4  ;;  %s57_s16 = int_to_ptr.vmem [resolvable:$true] %s56_s16  ;;  %s1749_s21 = int_to_ptr.vmem [resolvable:$true] %s84_s21 }
  0x49   :  { %s1499_s29 = scalar_lea.hbm %s1897_s4, 2048 }
  0x4a   :  { %p1500_p4 = scmp.ne.s32.totalorder %s1897_s4, %s1499_s29  ;;  %p1503_p5 = scmp.lt.u32.totalorder %s1499_s29, %s1897_s4 }
  0x4c   :  { %p1505_p6 = pnand %p1503_p5, %p1500_p4 }
  0x4e   :  { %1508 = shalt.err (!%p1505_p6)
}
  0x4f   :  { %s1509_s1 = scalar_lea.vmem %s57_s16, 2048  ;;  %p1514_p8 = scmp.lt.s32.totalorder %s57_s16, %s57_s16 }
  0x50   :  { %p1510_p7 = scmp.ne.s32.totalorder %s57_s16, %s1509_s1  ;;  %p1515_p9 = scmp.lt.s32.totalorder %s1509_s1, %s1509_s1 }
  0x52   :  { %p1516_p10 = por %p1515_p9, %p1514_p8 }
  0x54   :  { %p1517_p11 = pnand %p1516_p10, %p1510_p7 }
  0x56   :  { %1520 = shalt.err (!%p1517_p11)
}
  0x57   :  { %62 = dma.hbm_to_vmem [thread:$0]  %s1897_s4, 2048, %s57_s16, [#allocation5], %s1914_s30, %s1914_s30, %s1913_s18  }
  0x58   :  { %s1521_s17 = scalar_lea.hbm %s1901_s8, 1024 }
  0x59   :  { %p1522_p12 = scmp.ne.s32.totalorder %s1901_s8, %s1521_s17  ;;  %p1525_p13 = scmp.lt.u32.totalorder %s1521_s17, %s1901_s8 }
  0x5b   :  { %p1527_p0 = pnand %p1525_p13, %p1522_p12 }
  0x5d   :  { %1530 = shalt.err (!%p1527_p0)
}
  0x5e   :  { %s1531_s25 = scalar_lea.vmem %s1749_s21, 1024  ;;  %p1536_p2 = scmp.lt.s32.totalorder %s1749_s21, %s1749_s21 }
  0x5f   :  { %p1532_p1 = scmp.ne.s32.totalorder %s1749_s21, %s1531_s25  ;;  %p1537_p3 = scmp.lt.s32.totalorder %s1531_s25, %s1531_s25 }
  0x61   :  { %p1538_p4 = por %p1537_p3, %p1536_p2 }
  0x63   :  { %p1539_p5 = pnand %p1538_p4, %p1532_p1 }
  0x65   :  { %1542 = shalt.err (!%p1539_p5)
}
  0x66   :  { %90 = dma.hbm_to_vmem [thread:$0]  %s1901_s8, 1024, %s1749_s21, [#allocation8], %s1601_s3, %s1601_s3, %s1602_s19  }
  0x67   :  { %s1607_s26 = smov [#allocation12]   ;;  %s1608_s1 = smov [#allocation13]  }
  0x68   :  { %s110_s27 = sshll.u32 %s1607_s26, 4  ;;  %s122_s22 = sshll.u32 %s1608_s1, 4  ;;  %s111_s27 = int_to_ptr.vmem [resolvable:$true] %s110_s27  ;;  %s1786_s22 = int_to_ptr.vmem [resolvable:$true] %s122_s22 }
  0x69   :  { %s1543_s5 = scalar_lea.hbm %s1904_s11, 2048 }
  0x6a   :  { %p1544_p6 = scmp.ne.s32.totalorder %s1904_s11, %s1543_s5  ;;  %p1547_p7 = scmp.lt.u32.totalorder %s1543_s5, %s1904_s11 }
  0x6c   :  { %p1549_p8 = pnand %p1547_p7, %p1544_p6 }
  0x6e   :  { %1552 = shalt.err (!%p1549_p8)
}
  0x6f   :  { %s1553_s8 = scalar_lea.vmem %s111_s27, 2048  ;;  %p1558_p10 = scmp.lt.s32.totalorder %s111_s27, %s111_s27 }
  0x70   :  { %p1554_p9 = scmp.ne.s32.totalorder %s111_s27, %s1553_s8  ;;  %p1559_p11 = scmp.lt.s32.totalorder %s1553_s8, %s1553_s8 }
  0x72   :  { %p1560_p12 = por %p1559_p11, %p1558_p10 }
  0x74   :  { %p1561_p13 = pnand %p1560_p12, %p1554_p9 }
  0x76   :  { %1564 = shalt.err (!%p1561_p13)
}
  0x77   :  { %116 = dma.hbm_to_vmem [thread:$0]  %s1904_s11, 2048, %s111_s27, [#allocation11], %s1914_s30, %s1914_s30, %s1913_s18  }
  0x78   :  { %s1565_s16 = scalar_lea.hbm %s1905_s12, 1024 }
  0x79   :  { %p1566_p0 = scmp.ne.s32.totalorder %s1905_s12, %s1565_s16  ;;  %p1569_p1 = scmp.lt.u32.totalorder %s1565_s16, %s1905_s12 }
  0x7b   :  { %p1571_p2 = pnand %p1569_p1, %p1566_p0 }
  0x7d   :  { %1574 = shalt.err (!%p1571_p2)
}
  0x7e   :  { %s1575_s5 = scalar_lea.vmem %s1786_s22, 1024  ;;  %p1580_p4 = scmp.lt.s32.totalorder %s1786_s22, %s1786_s22 }
  0x7f   :  { %p1576_p3 = scmp.ne.s32.totalorder %s1786_s22, %s1575_s5  ;;  %p1581_p5 = scmp.lt.s32.totalorder %s1575_s5, %s1575_s5 }
  0x81   :  { %p1582_p6 = por %p1581_p5, %p1580_p4 }
  0x83   :  { %p1583_p7 = pnand %p1582_p6, %p1576_p3 }
  0x85   :  { %1586 = shalt.err (!%p1583_p7)
}
  0x86   :  { %128 = dma.hbm_to_vmem [thread:$0]  %s1905_s12, 1024, %s1786_s22, [#allocation14], %s1601_s3, %s1601_s3, %s1602_s19  }
  0x87   :  { %1587 = dma.done.wait [#allocation3], 128  }
  0x88   :  { %1588 = vsyncadd [#allocation3], 4294967168 }
  0x89   :  { %1589 = dma.done.wait [#allocation5], 4096  }
  0x8a   :  { %1590 = vsyncadd [#allocation5], 4294963200 }
  0x8b   :  { %1591 = dma.done.wait [#allocation8], 2048  }
  0x8c   :  { %1592 = vsyncadd [#allocation8], 4294965248 }
  0x8d   :  { %1593 = dma.done.wait [#allocation11], 4096  }
  0x8e   :  { %1594 = vsyncadd [#allocation11], 4294963200 }
  0x8f   :  { %1595 = dma.done.wait [#allocation14], 1024  }
  0x90   :  { %1596 = vsyncadd [#allocation14], 4294966272  ;;  %v1609_v0 = vmov 0   ;;  %v1291_v1 = vld [vmem:[#allocation4 + $0x4] ss:$8 sps:$4 sm:$0xff]   ;;  %v1828_v33 = vld [vmem:[%s1893_s0] sm:$0xff] }
  0x91   :  { %290 = vmatprep.mubr.bf16.mxu0 %v1609_v0  ;;  %428 = vmatprep.mubr.bf16.mxu1 %v1609_v0  ;;  %v1293_v2 = vld [vmem:[#allocation6 + $0x4] ss:$8 sps:$4 sm:$0xff]   ;;  %v1295_v3 = vld [vmem:[#allocation4] ss:$8 sps:$4 sm:$0xff]   ;;  %v1297_v5 = vld [vmem:[#allocation4 + $0x14] ss:$8 sps:$4 sm:$0xff]   ;;  %v161_v36 = vpack.c.bf16 %v1828_v33, %v1828_v33 }
  0x92   :  { %258 = vmatprep.subr.bf16.mxu0 %v1291_v1  ;;  %v1296_v4 = vld [vmem:[#allocation6] ss:$8 sps:$4 sm:$0xff]   ;;  %396 = vmatprep.subr.bf16.mxu1 %v1293_v2  ;;  %v1299_v6 = vld [vmem:[#allocation6 + $0x14] ss:$8 sps:$4 sm:$0xff]   ;;  %v1301_v7 = vld [vmem:[#allocation4 + $0x10] ss:$8 sps:$4 sm:$0xff]  }
  0x93   :  { %259 = vmatpush1.bf16.msra.mxu0 %v1295_v3  ;;  %397 = vmatpush1.bf16.msra.mxu1 %v1296_v4  ;;  %v1302_v8 = vld [vmem:[#allocation6 + $0x10] ss:$8 sps:$4 sm:$0xff]   ;;  %v1303_v9 = vld [vmem:[#allocation4 + $0x24] ss:$8 sps:$4 sm:$0xff]   ;;  %v1307_v11 = vld [vmem:[#allocation4 + $0x20] ss:$8 sps:$4 sm:$0xff]  }
  0x94   :  { %260 = vmatprep.subr.bf16.mxu0 %v1297_v5  ;;  %398 = vmatprep.subr.bf16.mxu1 %v1299_v6  ;;  %v1305_v10 = vld [vmem:[#allocation6 + $0x24] ss:$8 sps:$4 sm:$0xff]   ;;  %v1308_v12 = vld [vmem:[#allocation6 + $0x20] ss:$8 sps:$4 sm:$0xff]   ;;  %v1309_v13 = vld [vmem:[#allocation4 + $0x34] ss:$8 sps:$4 sm:$0xff]  }
  0x95   :  { %v1311_v14 = vld [vmem:[#allocation6 + $0x34] ss:$8 sps:$4 sm:$0xff]   ;;  %v1313_v15 = vld [vmem:[#allocation4 + $0x30] ss:$8 sps:$4 sm:$0xff]   ;;  %v1315_v17 = vld [vmem:[#allocation4 + $0x44] ss:$8 sps:$4 sm:$0xff]  }
  0x96   :  { %v1314_v16 = vld [vmem:[#allocation6 + $0x30] ss:$8 sps:$4 sm:$0xff]   ;;  %v1317_v18 = vld [vmem:[#allocation6 + $0x44] ss:$8 sps:$4 sm:$0xff]   ;;  %v1319_v19 = vld [vmem:[#allocation4 + $0x40] ss:$8 sps:$4 sm:$0xff]  }
  0x97   :  { %261 = vmatpush1.bf16.msra.mxu0 %v1301_v7  ;;  %399 = vmatpush1.bf16.msra.mxu1 %v1302_v8  ;;  %v1320_v20 = vld [vmem:[#allocation6 + $0x40] ss:$8 sps:$4 sm:$0xff]   ;;  %v1321_v21 = vld [vmem:[#allocation4 + $0x54] ss:$8 sps:$4 sm:$0xff]   ;;  %v1325_v23 = vld [vmem:[#allocation4 + $0x50] ss:$8 sps:$4 sm:$0xff]  }
  0x98   :  { %262 = vmatprep.subr.bf16.mxu0 %v1303_v9  ;;  %400 = vmatprep.subr.bf16.mxu1 %v1305_v10  ;;  %v1323_v22 = vld [vmem:[#allocation6 + $0x54] ss:$8 sps:$4 sm:$0xff]   ;;  %v1326_v24 = vld [vmem:[#allocation6 + $0x50] ss:$8 sps:$4 sm:$0xff]   ;;  %v1327_v25 = vld [vmem:[#allocation4 + $0x64] ss:$8 sps:$4 sm:$0xff]  }
  0x99   :  { %v1329_v26 = vld [vmem:[#allocation6 + $0x64] ss:$8 sps:$4 sm:$0xff]   ;;  %v1331_v27 = vld [vmem:[#allocation4 + $0x60] ss:$8 sps:$4 sm:$0xff]   ;;  %v1333_v29 = vld [vmem:[#allocation4 + $0x74] ss:$8 sps:$4 sm:$0xff]  }
  0x9a   :  { %v1332_v28 = vld [vmem:[#allocation6 + $0x60] ss:$8 sps:$4 sm:$0xff]   ;;  %v1335_v30 = vld [vmem:[#allocation6 + $0x74] ss:$8 sps:$4 sm:$0xff]   ;;  %v1337_v31 = vld [vmem:[#allocation4 + $0x70] ss:$8 sps:$4 sm:$0xff]  }
  0x9b   :  { %263 = vmatpush1.bf16.msra.mxu0 %v1307_v11  ;;  %401 = vmatpush1.bf16.msra.mxu1 %v1308_v12  ;;  %v1338_v32 = vld [vmem:[#allocation6 + $0x70] ss:$8 sps:$4 sm:$0xff]   ;;  %v1339_v35 = vld [vmem:[#allocation7] sm:$0xff]   ;;  %v1610_v38 = vmov 0.0   ;;  %v1340_v39 = vld [vmem:[#allocation7 + $0x8] sm:$0xff]   ;;  %vm1611_vm0 = vmmov 0  }
  0x9c   :  { %264 = vmatprep.subr.bf16.mxu0 %v1309_v13  ;;  %402 = vmatprep.subr.bf16.mxu1 %v1311_v14  ;;  %v1830_v34 = vld [vmem:[#allocation2] sm:$0xff]  ;;  %v1341_v40 = vld [vmem:[#allocation7 + $0x10] sm:$0xff]   ;;  %v1343_v42 = vld [vmem:[#allocation7 + $0x20] sm:$0xff]  }
  0x9d   :  { %v299_v37 = vpack.c.bf16 %v1830_v34, %v1830_v34  ;;  %v1342_v41 = vld [vmem:[#allocation7 + $0x18] sm:$0xff]   ;;  %v1344_v43 = vld [vmem:[#allocation7 + $0x28] sm:$0xff]   ;;  %v1345_v44 = vld [vmem:[#allocation7 + $0x30] sm:$0xff]  }
  0x9e   :  { %v1346_v45 = vld [vmem:[#allocation7 + $0x38] sm:$0xff]   ;;  %v1347_v46 = vld [vmem:[#allocation9] sm:$0xff]   ;;  %v1348_v47 = vld [vmem:[#allocation9 + $0x8] sm:$0xff]  }
  0x9f   :  { %265 = vmatpush1.bf16.msra.mxu0 %v1313_v15  ;;  %403 = vmatpush1.bf16.msra.mxu1 %v1314_v16  ;;  %v1349_v48 = vld [vmem:[#allocation9 + $0x10] sm:$0xff]   ;;  %v1350_v49 = vld [vmem:[#allocation9 + $0x18] sm:$0xff]   ;;  %v1351_v50 = vld [vmem:[#allocation9 + $0x20] sm:$0xff]  }
  0xa0   :  { %266 = vmatprep.subr.bf16.mxu0 %v1315_v17  ;;  %404 = vmatprep.subr.bf16.mxu1 %v1317_v18  ;;  %v1352_v51 = vld [vmem:[#allocation9 + $0x28] sm:$0xff]   ;;  %v1128_v52 = vld [vmem:[%s1899_s6] ss:$0 sm:$0xff]  ;;  %v1353_v7 = vld [vmem:[#allocation9 + $0x30] sm:$0xff]  }
  0xa1   :  { %v1354_v8 = vld [vmem:[#allocation9 + $0x38] sm:$0xff]   ;;  %v1357_v9 = vld [vmem:[#allocation12 + $0x4] ss:$8 sps:$4 sm:$0xff]   ;;  %v1379_v10 = vld [vmem:[#allocation10] ss:$8 sps:$4 sm:$0xff]  }
  0xa2   :  { %v1381_v11 = vld [vmem:[#allocation10 + $0x4] ss:$8 sps:$4 sm:$0xff]   ;;  %v1384_v12 = vld [vmem:[#allocation10 + $0x14] ss:$8 sps:$4 sm:$0xff]   ;;  %v1382_v13 = vld [vmem:[#allocation10 + $0x10] ss:$8 sps:$4 sm:$0xff]  }
  0xa3   :  { %267 = vmatpush1.bf16.msra.mxu0 %v1319_v19  ;;  %405 = vmatpush1.bf16.msra.mxu1 %v1320_v20  ;;  %v1387_v14 = vld [vmem:[#allocation10 + $0x24] ss:$8 sps:$4 sm:$0xff]   ;;  %v1385_v15 = vld [vmem:[#allocation10 + $0x20] ss:$8 sps:$4 sm:$0xff]   ;;  %v1390_v16 = vld [vmem:[#allocation10 + $0x34] ss:$8 sps:$4 sm:$0xff]  }
  0xa4   :  { %268 = vmatprep.subr.bf16.mxu0 %v1321_v21  ;;  %406 = vmatprep.subr.bf16.mxu1 %v1323_v22  ;;  %v1388_v17 = vld [vmem:[#allocation10 + $0x30] ss:$8 sps:$4 sm:$0xff]   ;;  %v1393_v18 = vld [vmem:[#allocation10 + $0x44] ss:$8 sps:$4 sm:$0xff]   ;;  %v1391_v19 = vld [vmem:[#allocation10 + $0x40] ss:$8 sps:$4 sm:$0xff]  }
  0xa5   :  { %v1396_v20 = vld [vmem:[#allocation10 + $0x54] ss:$8 sps:$4 sm:$0xff]   ;;  %v1394_v21 = vld [vmem:[#allocation10 + $0x50] ss:$8 sps:$4 sm:$0xff]   ;;  %v1399_v22 = vld [vmem:[#allocation10 + $0x64] ss:$8 sps:$4 sm:$0xff]  }
  0xa7   :  { %269 = vmatpush1.bf16.msra.mxu0 %v1325_v23  ;;  %407 = vmatpush1.bf16.msra.mxu1 %v1326_v24  ;;  %v1397_v23 = vld [vmem:[#allocation10 + $0x60] ss:$8 sps:$4 sm:$0xff]  }
  0xa8   :  { %270 = vmatprep.subr.bf16.mxu0 %v1327_v25  ;;  %408 = vmatprep.subr.bf16.mxu1 %v1329_v26  ;;  %v1137_v25 = vld [vmem:[%s1900_s7] ss:$0 sm:$0xff] }
  0xab   :  { %271 = vmatpush1.bf16.msra.mxu0 %v1331_v27  ;;  %409 = vmatpush1.bf16.msra.mxu1 %v1332_v28 }
  0xac   :  { %272 = vmatprep.subr.bf16.mxu0 %v1333_v29  ;;  %410 = vmatprep.subr.bf16.mxu1 %v1335_v30 }
  0xaf   :  { %273 = vmatpush1.bf16.msra.mxu0 %v1337_v31  ;;  %411 = vmatpush1.bf16.msra.mxu1 %v1338_v32  ;;  %v1355_v32 = vld [vmem:[#allocation12] ss:$8 sps:$4 sm:$0xff]  }
  0xb0   :  { %1216 = vmatprep.subr.bf16.mxu0 %v1610_v38  ;;  %1236 = vmatprep.subr.bf16.mxu1 %v1610_v38 }
  0xb2   :  { %291 = vmatmul.mubr.bf16.vlgmr.msra.gmra.mrb[0].mxu0 %v161_v36  ;;  %429 = vmatmul.mubr.bf16.vlgmr.msra.gmra.mrb[0].mxu1 %v299_v37  ;;  %v1363_v36 = vld [vmem:[#allocation12 + $0x24] ss:$8 sps:$4 sm:$0xff]   ;;  %v1361_v37 = vld [vmem:[#allocation12 + $0x20] ss:$8 sps:$4 sm:$0xff]  }
  0xb3   :  { %1217 = vmatpush3.bf16.msra.mxu0 %v1339_v35  ;;  %1232 = vmatprep.mubr.msk.bf16.mxu0 %vm1611_vm0, %v1610_v38  ;;  %v1358_v35 = vld [vmem:[#allocation12 + $0x10] ss:$8 sps:$4 sm:$0xff]  }
  0xb4   :  { %1218 = vmatprep.subr.bf16.mxu0 %v1610_v38  ;;  %1252 = vmatprep.mubr.msk.bf16.mxu1 %vm1611_vm0, %v1610_v38 }
  0xb5   :  { %1237 = vmatpush3.bf16.msra.mxu1 %v1347_v46  ;;  %v1378_v46 = vld [vmem:[#allocation12 + $0x74] ss:$8 sps:$4 sm:$0xff]  }
  0xb6   :  { %1238 = vmatprep.subr.bf16.mxu1 %v1610_v38 }
  0xb7   :  { %1219 = vmatpush3.bf16.msra.mxu0 %v1340_v39  ;;  %v1366_v39 = vld [vmem:[#allocation12 + $0x34] ss:$8 sps:$4 sm:$0xff]  }
  0xb8   :  { %1220 = vmatprep.subr.bf16.mxu0 %v1610_v38 }
  0xb9   :  { %1239 = vmatpush3.bf16.msra.mxu1 %v1348_v47  ;;  %v1376_v47 = vld [vmem:[#allocation12 + $0x70] ss:$8 sps:$4 sm:$0xff]  }
  0xba   :  { %1240 = vmatprep.subr.bf16.mxu1 %v1610_v38 }
  0xbb   :  { %1221 = vmatpush3.bf16.msra.mxu0 %v1341_v40  ;;  %v1364_v40 = vld [vmem:[#allocation12 + $0x30] ss:$8 sps:$4 sm:$0xff]  }
  0xbc   :  { %1222 = vmatprep.subr.bf16.mxu0 %v1610_v38 }
  0xbd   :  { %1241 = vmatpush3.bf16.msra.mxu1 %v1349_v48  ;;  %v160_v48 = vld [vmem:[%s1895_s2] sm:$0xff] }
  0xbe   :  { %1242 = vmatprep.subr.bf16.mxu1 %v1610_v38 }
  0xbf   :  { %1223 = vmatpush3.bf16.msra.mxu0 %v1342_v41  ;;  %v1369_v41 = vld [vmem:[#allocation12 + $0x44] ss:$8 sps:$4 sm:$0xff]  }
  0xc0   :  { %1224 = vmatprep.subr.bf16.mxu0 %v1610_v38 }
  0xc1   :  { %1243 = vmatpush3.bf16.msra.mxu1 %v1350_v49  ;;  %v817_v49 = vpack.c.bf16 %v160_v48, %v160_v48 }
  0xc2   :  { %1244 = vmatprep.subr.bf16.mxu1 %v1610_v38 }
  0xc3   :  { %1225 = vmatpush3.bf16.msra.mxu0 %v1343_v42  ;;  %v1367_v42 = vld [vmem:[#allocation12 + $0x40] ss:$8 sps:$4 sm:$0xff]  }
  0xc4   :  { %1226 = vmatprep.subr.bf16.mxu0 %v1610_v38 }
  0xc5   :  { %1245 = vmatpush3.bf16.msra.mxu1 %v1351_v50  ;;  %v1402_v50 = vld [vmem:[#allocation10 + $0x74] ss:$8 sps:$4 sm:$0xff]  }
  0xc6   :  { %1246 = vmatprep.subr.bf16.mxu1 %v1610_v38 }
  0xc7   :  { %1227 = vmatpush3.bf16.msra.mxu0 %v1344_v43  ;;  %v1372_v43 = vld [vmem:[#allocation12 + $0x54] ss:$8 sps:$4 sm:$0xff]  }
  0xc8   :  { %1228 = vmatprep.subr.bf16.mxu0 %v1610_v38 }
  0xc9   :  { %1247 = vmatpush3.bf16.msra.mxu1 %v1352_v51  ;;  %v1400_v51 = vld [vmem:[#allocation10 + $0x70] ss:$8 sps:$4 sm:$0xff]  }
  0xca   :  { %1248 = vmatprep.subr.bf16.mxu1 %v1610_v38 }
  0xcb   :  { %1229 = vmatpush3.bf16.msra.mxu0 %v1345_v44  ;;  %v1370_v44 = vld [vmem:[#allocation12 + $0x50] ss:$8 sps:$4 sm:$0xff]  }
  0xcc   :  { %1230 = vmatprep.subr.bf16.mxu0 %v1610_v38 }
  0xcd   :  { %1249 = vmatpush3.bf16.msra.mxu1 %v1353_v7 }
  0xce   :  { %1250 = vmatprep.subr.bf16.mxu1 %v1610_v38 }
  0xcf   :  { %1231 = vmatpush3.bf16.msra.mxu0 %v1346_v45  ;;  %v1375_v45 = vld [vmem:[#allocation12 + $0x64] ss:$8 sps:$4 sm:$0xff]  }
  0xd0   :  { %776 = vmatprep.subr.bf16.mxu0 %v1381_v11  ;;  %v1410_v11 = vld [vmem:[#allocation13 + $0x38] sm:$0xff]  }
  0xd1   :  { %1251 = vmatpush3.bf16.msra.mxu1 %v1354_v8 }
  0xd2   :  { %914 = vmatprep.subr.bf16.mxu1 %v1357_v9 }
 0x185   :  { %v292_v53 = vpop.f32.mrb[0].mxu0  ;;  %v430_v54 = vpop.f32.mrb[0].mxu1 }
 0x186   :  { %v444_v55 = vadd.f32 %v1128_v52, %v292_v53  ;;  %v445_v56 = vadd.f32 %v1128_v52, %v430_v54  ;;  %v294_v57 = vpop.f32.mrb[1].mxu0  ;;  %v432_v58 = vpop.f32.mrb[1].mxu1  ;;  %v1138_v52 = vld [vmem:[%s1902_s9] ss:$0 sm:$0xff] }
 0x187   :  { %v451_v59 = vadd.f32 %v432_v58, %v294_v57  ;;  %v434_v60 = vpop.f32.mrb[2].mxu1  ;;  %v296_v61 = vpop.f32.mrb[2].mxu0  ;;  %v1403_v57 = vld [vmem:[#allocation13] sm:$0xff]  }
 0x188   :  { %v446_v62 = vmul.f32 %v445_v56, %v1828_v33  ;;  %v435_v63 = vpop.f32.mrb[3].mxu1  ;;  %v297_v1 = vpop.f32.mrb[3].mxu0  ;;  %v449_v2 = vmul.f32 %v444_v55, %v1830_v34  ;;  %v1404_v60 = vld [vmem:[#allocation13 + $0x8] sm:$0xff]   ;;  %v1405_v61 = vld [vmem:[#allocation13 + $0x10] sm:$0xff]  }
 0x189   :  { %v1407_v63 = vld [vmem:[#allocation13 + $0x20] sm:$0xff]   ;;  %v1408_v1 = vld [vmem:[#allocation13 + $0x28] sm:$0xff]  }
 0x18a   :  { %v447_v3 = vadd.f32 %v446_v62, %v1828_v33  ;;  %v1406_v62 = vld [vmem:[#allocation13 + $0x18] sm:$0xff]  }
 0x18c   :  { %v448_v4 = vadd.f32 %v447_v3, %v1830_v34  ;;  %v1360_v34 = vld [vmem:[#allocation12 + $0x14] ss:$8 sps:$4 sm:$0xff]  }
 0x18e   :  { %v450_v5 = vadd.f32 %v449_v2, %v448_v4  ;;  %v1179_v2 = vld [vmem:[%s1906_s13] ss:$0 sm:$0xff] }
 0x190   :  { %v452_v6 = vpack.c.bf16 %v450_v5, %v450_v5 }
 0x192   :  { %1233 = vmatmul.mubr.bf16.vlgmr.msra.gmra.mrb[4].mxu0 %v452_v6 }
 0x193   :  { %808 = vmatprep.mubr.bf16.mxu0 %v1609_v0  ;;  %777 = vmatpush1.bf16.msra.mxu0 %v1379_v10  ;;  %v1409_v10 = vld [vmem:[#allocation13 + $0x30] sm:$0xff]  }
 0x194   :  { %778 = vmatprep.subr.bf16.mxu0 %v1384_v12 }
 0x197   :  { %779 = vmatpush1.bf16.msra.mxu0 %v1382_v13 }
 0x198   :  { %780 = vmatprep.subr.bf16.mxu0 %v1387_v14 }
 0x19b   :  { %781 = vmatpush1.bf16.msra.mxu0 %v1385_v15 }
 0x19c   :  { %782 = vmatprep.subr.bf16.mxu0 %v1390_v16 }
 0x19f   :  { %783 = vmatpush1.bf16.msra.mxu0 %v1388_v17 }
 0x1a0   :  { %784 = vmatprep.subr.bf16.mxu0 %v1393_v18 }
 0x1a3   :  { %785 = vmatpush1.bf16.msra.mxu0 %v1391_v19 }
 0x1a4   :  { %786 = vmatprep.subr.bf16.mxu0 %v1396_v20 }
 0x1a7   :  { %787 = vmatpush1.bf16.msra.mxu0 %v1394_v21 }
 0x1a8   :  { %788 = vmatprep.subr.bf16.mxu0 %v1399_v22 }
 0x1ab   :  { %789 = vmatpush1.bf16.msra.mxu0 %v1397_v23  ;;  %v1188_v23 = vld [vmem:[%s1907_s14] ss:$0 sm:$0xff] }
 0x1ac   :  { %790 = vmatprep.subr.bf16.mxu0 %v1402_v50 }
 0x1af   :  { %791 = vmatpush1.bf16.msra.mxu0 %v1400_v51 }
 0x1b0   :  { %1256 = vmatprep.subr.bf16.mxu0 %v1610_v38 }
 0x265   :  { %v551_v24 = vpop.f32.mrb[4].mxu0 }
 0x266   :  { %v557_v26 = vadd.f32 %v551_v24, %v451_v59  ;;  %v1234_v27 = vpop.f32.mrb[5].mxu0 }
 0x267   :  { %v554_v28 = vpop.f32.mrb[6].mxu0 }
 0x268   :  { %v565_v29 = vadd.f32 %v1137_v25, %v557_v26  ;;  %v1235_v30 = vpop.f32.mrb[7].mxu0 }
 0x26a   :  { %v566_v31 = vmax.f32 %v565_v29, 0.0 }
 0x26c   :  { %v567_v33 = vpack.c.bf16 %v566_v31, %v566_v31 }
 0x26e   :  { %1253 = vmatmul.mubr.bf16.vlgmr.msra.gmra.mrb[4].mxu1 %v567_v33 }
 0x26f   :  { %915 = vmatpush1.bf16.msra.mxu1 %v1355_v32  ;;  %946 = vmatprep.mubr.bf16.mxu1 %v1609_v0  ;;  %v1373_v0 = vld [vmem:[#allocation12 + $0x60] ss:$8 sps:$4 sm:$0xff]  }
 0x270   :  { %916 = vmatprep.subr.bf16.mxu1 %v1360_v34 }
 0x273   :  { %917 = vmatpush1.bf16.msra.mxu1 %v1358_v35 }
 0x274   :  { %918 = vmatprep.subr.bf16.mxu1 %v1363_v36 }
 0x277   :  { %919 = vmatpush1.bf16.msra.mxu1 %v1361_v37 }
 0x278   :  { %920 = vmatprep.subr.bf16.mxu1 %v1366_v39 }
 0x27b   :  { %921 = vmatpush1.bf16.msra.mxu1 %v1364_v40 }
 0x27c   :  { %922 = vmatprep.subr.bf16.mxu1 %v1369_v41 }
 0x27f   :  { %923 = vmatpush1.bf16.msra.mxu1 %v1367_v42 }
 0x280   :  { %924 = vmatprep.subr.bf16.mxu1 %v1372_v43 }
 0x283   :  { %925 = vmatpush1.bf16.msra.mxu1 %v1370_v44 }
 0x284   :  { %926 = vmatprep.subr.bf16.mxu1 %v1375_v45 }
 0x287   :  { %927 = vmatpush1.bf16.msra.mxu1 %v1373_v0 }
 0x288   :  { %928 = vmatprep.subr.bf16.mxu1 %v1378_v46 }
 0x28b   :  { %929 = vmatpush1.bf16.msra.mxu1 %v1376_v47 }
 0x28e   :  { %947 = vmatmul.mubr.bf16.vlgmr.msra.gmra.mrb[8].mxu1 %v817_v49 }
 0x341   :  { %v673_v53 = vpop.f32.mrb[4].mxu1 }
 0x342   :  { %v674_v54 = vadd.f32 %v1138_v52, %v673_v53  ;;  %v1254_v55 = vpop.f32.mrb[5].mxu1 }
 0x343   :  { %v676_v56 = vpop.f32.mrb[6].mxu1 }
 0x344   :  { %v679_v58 = vpack.c.bf16 %v674_v54, %v674_v54  ;;  %v1255_v59 = vpop.f32.mrb[7].mxu1 }
 0x346   :  { %809 = vmatmul.mubr.bf16.vlgmr.msra.gmra.mrb[8].mxu0 %v679_v58 }
 0x347   :  { %1257 = vmatpush3.bf16.msra.mxu0 %v1403_v57  ;;  %1272 = vmatprep.mubr.msk.bf16.mxu0 %vm1611_vm0, %v1610_v38 }
 0x348   :  { %1258 = vmatprep.subr.bf16.mxu0 %v1610_v38 }
 0x34b   :  { %1259 = vmatpush3.bf16.msra.mxu0 %v1404_v60 }
 0x34c   :  { %1260 = vmatprep.subr.bf16.mxu0 %v1610_v38 }
 0x34f   :  { %1261 = vmatpush3.bf16.msra.mxu0 %v1405_v61 }
 0x350   :  { %1262 = vmatprep.subr.bf16.mxu0 %v1610_v38 }
 0x353   :  { %1263 = vmatpush3.bf16.msra.mxu0 %v1406_v62 }
 0x354   :  { %1264 = vmatprep.subr.bf16.mxu0 %v1610_v38 }
 0x357   :  { %1265 = vmatpush3.bf16.msra.mxu0 %v1407_v63 }
 0x358   :  { %1266 = vmatprep.subr.bf16.mxu0 %v1610_v38 }
 0x35b   :  { %1267 = vmatpush3.bf16.msra.mxu0 %v1408_v1 }
 0x35c   :  { %1268 = vmatprep.subr.bf16.mxu0 %v1610_v38 }
 0x35f   :  { %1269 = vmatpush3.bf16.msra.mxu0 %v1409_v10 }
 0x360   :  { %1270 = vmatprep.subr.bf16.mxu0 %v1610_v38 }
 0x361   :  { %v948_v3 = vpop.f32.mrb[8].mxu1 }
 0x362   :  { %v963_v4 = vadd.f32 %v1179_v2, %v948_v3  ;;  %v950_v5 = vpop.f32.mrb[9].mxu1 }
 0x363   :  { %v952_v6 = vpop.f32.mrb[10].mxu1  ;;  %1271 = vmatpush3.bf16.msra.mxu0 %v1410_v11 }
 0x364   :  { %v964_v7 = vmul.f32 %v963_v4, %v674_v54  ;;  %v953_v8 = vpop.f32.mrb[11].mxu1 }
 0x366   :  { %v965_v9 = vadd.f32 %v964_v7, %v674_v54 }
 0x368   :  { %v966_v17 = vadd.f32 %v965_v9, %v160_v48 }
 0x419   :  { %v810_v12 = vpop.f32.mrb[8].mxu0 }
 0x41a   :  { %v962_v13 = vadd.f32 %v1179_v2, %v810_v12  ;;  %v812_v14 = vpop.f32.mrb[9].mxu0 }
 0x41b   :  { %v969_v15 = vadd.f32 %v950_v5, %v812_v14  ;;  %v814_v16 = vpop.f32.mrb[10].mxu0 }
 0x41c   :  { %v967_v18 = vmul.f32 %v962_v13, %v160_v48  ;;  %v815_v19 = vpop.f32.mrb[11].mxu0 }
 0x41e   :  { %v968_v20 = vadd.f32 %v967_v18, %v966_v17 }
 0x420   :  { %v970_v21 = vpack.c.bf16 %v968_v20, %v968_v20 }
 0x422   :  { %1273 = vmatmul.mubr.bf16.vlgmr.msra.gmra.mrb[12].mxu0 %v970_v21 }
 0x4f5   :  { %v1069_v22 = vpop.f32.mrb[12].mxu0 }
 0x4f6   :  { %v1075_v24 = vadd.f32 %v1069_v22, %v969_v15  ;;  %v1274_v38 = vpop.f32.mrb[13].mxu0 }
 0x4f7   :  { %v1072_v25 = vpop.f32.mrb[14].mxu0 }
 0x4f8   :  { %v1083_v26 = vadd.f32 %v1188_v23, %v1075_v24  ;;  %v1275_v27 = vpop.f32.mrb[15].mxu0 }
 0x4fa   :  { %v1084_v28 = vmax.f32 %v1083_v26, 0.0 }
 0x4fc   :  { %v1085_v29 = vpack.c.bf16 %v1084_v28, %v1084_v28 }
 0x4fe   :  { %1086 = vst [vmem:[%s1908_s15] sm:$0xf] %v1085_v29 }
 0x4ff   :  { %1091 = vsyncpa [#allocation3], 1 }
 0x500   :  { %1092 = vsyncpa [#allocation5], 1 }
 0x501   :  { %1093 = vsyncpa [#allocation8], 1 }
 0x502   :  { %1094 = vsyncpa [#allocation11], 1 }
 0x503   :  { %1095 = vsyncpa [#allocation14], 1 }

</bundles_post_ra>
